<compile_context>
chip_gen: v5e
topology: v5e:2x2
jax: 0.10.0
libtpu: 0.0.40
codegen_flags: <defaults>
</compile_context>

<pallas_src>
import jax
import jax.numpy as jnp
from jax.experimental import pallas as pl
from jax.experimental.pallas import tpu as pltpu

LEAKY_SLOPE = 0.01  # nn.LeakyReLU() default negative_slope
MAX_BN = 8          # cap on the batch block (static per-sample unroll in-kernel)


def _attention_kernel(v_ref, qm_ref, wv_ref, wx_ref, bx_ref, o_ref):
    # v_ref : (bn, v_feat, tp)   pixel tile(s), channels-major, pixels on lanes
    # qm_ref: (bn, mid, 1)       precomputed q @ Wq.T + bq  (f32)
    # wv_ref: (mid, v_feat)      v_conv.weight (no bias)
    # wx_ref: (glimpses, mid)    x_conv.weight
    # bx_ref: (glimpses, 1)      x_conv.bias  (f32)
    # o_ref : (bn, glimpses, tp)
    wv = wv_ref[...]
    wx = wx_ref[...]
    bx = bx_ref[...]
    bn = v_ref.shape[0]
    for b in range(bn):  # static unroll, bn <= MAX_BN
        # ---- v_conv (1x1, no bias): one MXU matmul, lane axis = pixels ----
        hv = jnp.dot(wv, v_ref[b], preferred_element_type=jnp.float32)  # (mid, tp)
        # ---- tile q over spatial + LeakyReLU (f32 epilogue) ----
        h = hv + qm_ref[b]                                              # lane broadcast
        h = jnp.where(h > 0, h, LEAKY_SLOPE * h)
        # ---- x_conv (1x1, bias): one MXU matmul, single lane-dense store ----
        out = jnp.dot(wx, h.astype(wx.dtype),
                      preferred_element_type=jnp.float32) + bx
        o_ref[b] = out.astype(o_ref.dtype)


def _vmem_capacity_bytes():
    try:
        return int(pltpu.get_tpu_info().vmem_capacity_bytes)
    except Exception:
        return 64 << 20  # conservative per-TensorCore figure (v7x)


def _choose_tiling(N, P, v_feat, mid, glimpses, itemsize, budget):
    """Pick (bn, tp): batch-block and spatial-tile sizes, VMEM/dtype aware."""
    def tile_bytes(bn, tp):
        # double-buffered input + output tiles, plus the tiny qm tile (f32)
        return 2 * bn * (v_feat + glimpses) * tp * itemsize + 2 * bn * mid * 4

    # Spatial tile candidates: multiples of 128 evenly dividing P, plus the
    # full extent P (legal block even when P % 128 != 0, just lane-padded).
    tp_divs = sorted({t for t in range(128, P + 1, 128) if P % t == 0} | {P},
                     reverse=True)

    if P > 1024:
        # Large feature maps: tile the spatial axis, one sample per block.
        for tp in tp_divs:
            if tile_bytes(1, tp) <= budget:
                return 1, tp
        return 1, min(tp_divs)

    # Small feature maps: full spatial extent, block over the batch instead.
    tp = P
    bn_cands = sorted((b for b in range(1, min(N, MAX_BN) + 1) if N % b == 0),
                      reverse=True)
    for bn in bn_cands:
        # keep >= 2 parallel grid blocks when possible (feeds both v7x cores)
        if N >= 2 and N // bn < 2:
            continue
        if tile_bytes(bn, tp) <= budget:
            return bn, tp
    return 1, tp


def attention(v, q, wv, wq, bq, wx, bx, *, compute_dtype=None):
    """v: (N, v_feat, H, W)  q: (N, q_feat)
       wv: (mid, v_feat)  wq: (mid, q_feat)  bq: (mid,)
       wx: (glimpses, mid)  bx: (glimpses,)        -> (N, glimpses, H, W)"""
    N, v_feat, H, W = v.shape
    mid = wv.shape[0]
    glimpses = wx.shape[0]
    P = H * W
    out_dtype = v.dtype

    # Hoist the per-sample q projection out of the kernel (depends only on n).
    qm = (jnp.dot(q.astype(jnp.float32), wq.astype(jnp.float32).T,
                  precision='highest')
          + bq.astype(jnp.float32)).reshape(N, mid, 1)

    if compute_dtype is not None:
        v = v.astype(compute_dtype)
        wv = wv.astype(compute_dtype)
        wx = wx.astype(compute_dtype)

    v_flat = v.reshape(N, v_feat, P)          # free reshape, layout preserved
    bx_col = bx.astype(jnp.float32).reshape(glimpses, 1)

    itemsize = jnp.dtype(v.dtype).itemsize
    vmem_cap = _vmem_capacity_bytes()
    budget = min(vmem_cap // 2, 48 << 20)     # working-set cap for tile choice
    bn, tp = _choose_tiling(N, P, v_feat, mid, glimpses, itemsize, budget)
    grid = (N // bn, P // tp)

    weight_bytes = (wv.size + wx.size) * itemsize + (bx_col.size + qm.size) * 4
    tile_bytes = 2 * bn * (v_feat + glimpses) * tp * itemsize + 2 * bn * mid * 4
    vmem_limit = max(32 << 20, int(1.5 * (tile_bytes + weight_bytes)))
    vmem_limit = min(vmem_limit, 96 << 20, max(32 << 20, vmem_cap - (16 << 20)))

    flops = 2 * N * P * v_feat * mid + 2 * N * P * mid * glimpses
    bytes_accessed = ((v_flat.size + wv.size + wx.size) * itemsize
                      + (qm.size + bx_col.size) * 4
                      + N * glimpses * P * jnp.dtype(out_dtype).itemsize)

    out = pl.pallas_call(
        _attention_kernel,
        out_shape=jax.ShapeDtypeStruct((N, glimpses, P), out_dtype),
        grid_spec=pltpu.PrefetchScalarGridSpec(
            num_scalar_prefetch=0,
            grid=grid,
            in_specs=[
                pl.BlockSpec((bn, v_feat, tp), lambda n, p: (n, 0, p)),
                pl.BlockSpec((bn, mid, 1), lambda n, p: (n, 0, 0)),
                pl.BlockSpec((mid, v_feat), lambda n, p: (0, 0)),
                pl.BlockSpec((glimpses, mid), lambda n, p: (0, 0)),
                pl.BlockSpec((glimpses, 1), lambda n, p: (0, 0)),
            ],
            out_specs=pl.BlockSpec((bn, glimpses, tp), lambda n, p: (n, 0, p)),
        ),
        compiler_params=pltpu.CompilerParams(
            dimension_semantics=("parallel", "parallel"),
            vmem_limit_bytes=int(vmem_limit)),
        cost_estimate=pl.CostEstimate(
            flops=int(flops), transcendentals=0,
            bytes_accessed=int(bytes_accessed)),
    )(v_flat, qm, wv, wx, bx_col)

    return out.reshape(N, glimpses, H, W)


def attention_reference(v, q, wv, wq, bq, wx, bx):
    vm = jnp.einsum('mc,nchw->nmhw', wv, v, precision='highest')
    qm = jnp.dot(q, wq.T, precision='highest') + bq            # (N, mid)
    x = vm + qm[:, :, None, None]
    x = jnp.where(x > 0, x, LEAKY_SLOPE * x)
    out = jnp.einsum('gm,nmhw->nghw', wx, x, precision='highest')
    return out + bx[None, :, None, None]


if __name__ == "__main__":
    # Small shapes consistent with the module:
    # N=2, v_features=32, q_features=16, mid_features=64, glimpses=2, 16x16 map
    N, v_feat, q_feat, mid, glimpses, H, W = 2, 32, 16, 64, 2, 16, 16

    key = jax.random.PRNGKey(0)
    kv, kq, kwv, kwq, kbq, kwx, kbx = jax.random.split(key, 7)

    v = jax.random.normal(kv, (N, v_feat, H, W), jnp.float32)
    q = jax.random.normal(kq, (N, q_feat), jnp.float32)
    # v_conv.weight: (mid, v_feat, 1, 1) -> (mid, v_feat), bias=False
    wv = jax.random.normal(kwv, (mid, v_feat), jnp.float32) * 0.1
    # q_lin.weight: (mid, q_feat), q_lin.bias: (mid,)
    wq = jax.random.normal(kwq, (mid, q_feat), jnp.float32) * 0.1
    bq = jax.random.normal(kbq, (mid,), jnp.float32) * 0.1
    # x_conv.weight: (glimpses, mid, 1, 1) -> (glimpses, mid), bias: (glimpses,)
    wx = jax.random.normal(kwx, (glimpses, mid), jnp.float32) * 0.1
    bx = jax.random.normal(kbx, (glimpses,), jnp.float32) * 0.1

    ref = attention_reference(v, q, wv, wq, bq, wx, bx)

    # f32 path (default): tight tolerance vs. the f32 reference.
    out = jax.block_until_ready(attention(v, q, wv, wq, bq, wx, bx))
    assert out.shape == (N, glimpses, H, W)
    assert jnp.allclose(out, ref, atol=1e-4, rtol=1e-4), "f32 mismatch vs reference"

    # Optional bf16-input path (halves HBM traffic); accumulation stays f32.
    out_bf16 = jax.block_until_ready(
        attention(v, q, wv, wq, bq, wx, bx, compute_dtype=jnp.bfloat16))
    assert out_bf16.shape == (N, glimpses, H, W)
    assert jnp.allclose(out_bf16, ref, atol=5e-2, rtol=5e-2), "bf16 mismatch vs reference"

    print("KERNEL_OK")
</pallas_src>

<mosaic_0001>
module attributes {stable_mosaic.version = 11 : i64} {
  func.func @_attention_kernel(%arg0: i32, %arg1: i32, %arg2: memref<1x32x256xf32, #tpu.memory_space<vmem>>, %arg3: memref<1x64x1xf32, #tpu.memory_space<vmem>>, %arg4: memref<64x32xf32, #tpu.memory_space<vmem>>, %arg5: memref<2x64xf32, #tpu.memory_space<vmem>>, %arg6: memref<2x1xf32, #tpu.memory_space<vmem>>, %arg7: memref<1x2x256xf32, #tpu.memory_space<vmem>>) attributes {dimension_semantics = [#tpu.dimension_semantics<parallel>, #tpu.dimension_semantics<parallel>], iteration_bounds = array<i64: 2, 1>, scalar_prefetch = 0 : i64, scratch_operands = 0 : i64, tpu.core_type = #tpu.core_type<tc>, window_params = [{transform_indices = @transform_0, window_bounds = array<i64: 1, 32, 256>}, {transform_indices = @transform_1, window_bounds = array<i64: 1, 64, 1>}, {pipeline_mode = #tpu.pipeline_mode<synchronous>, transform_indices = @transform_2, window_bounds = array<i64: 64, 32>}, {pipeline_mode = #tpu.pipeline_mode<synchronous>, transform_indices = @transform_3, window_bounds = array<i64: 2, 64>}, {pipeline_mode = #tpu.pipeline_mode<synchronous>, transform_indices = @transform_4, window_bounds = array<i64: 2, 1>}, {transform_indices = @transform_5, window_bounds = array<i64: 1, 2, 256>}]} {
    %c0 = arith.constant 0 : index
    %c0_0 = arith.constant 0 : index
    %0 = vector.load %arg4[%c0, %c0_0] : memref<64x32xf32, #tpu.memory_space<vmem>>, vector<64x32xf32>
    %c0_1 = arith.constant 0 : index
    %c0_2 = arith.constant 0 : index
    %1 = vector.load %arg5[%c0_1, %c0_2] : memref<2x64xf32, #tpu.memory_space<vmem>>, vector<2x64xf32>
    %c0_3 = arith.constant 0 : index
    %c0_4 = arith.constant 0 : index
    %2 = vector.load %arg6[%c0_3, %c0_4] : memref<2x1xf32, #tpu.memory_space<vmem>>, vector<2x1xf32>
    %c0_5 = arith.constant 0 : index
    %c0_6 = arith.constant 0 : index
    %c0_7 = arith.constant 0 : index
    %3 = vector.load %arg2[%c0_5, %c0_6, %c0_7] : memref<1x32x256xf32, #tpu.memory_space<vmem>>, vector<1x32x256xf32>
    %4 = vector.shape_cast %3 : vector<1x32x256xf32> to vector<32x256xf32>
    %cst = arith.constant dense<0.000000e+00> : vector<64x256xf32>
    %5 = tpu.matmul %0, %4, %cst {dimension_numbers = #tpu.dot_dimension_numbers<[1], [0], [0], [1], [0, 0, 1, 1], [], []>} : vector<64x32xf32>, vector<32x256xf32>, vector<64x256xf32> -> vector<64x256xf32>
    %c0_8 = arith.constant 0 : index
    %c0_9 = arith.constant 0 : index
    %c0_10 = arith.constant 0 : index
    %6 = vector.load %arg3[%c0_8, %c0_9, %c0_10] : memref<1x64x1xf32, #tpu.memory_space<vmem>>, vector<1x64x1xf32>
    %7 = vector.shape_cast %6 : vector<1x64x1xf32> to vector<64x1xf32>
    %8 = vector.broadcast %7 : vector<64x1xf32> to vector<64x256xf32>
    %9 = arith.addf %5, %8 : vector<64x256xf32>
    %cst_11 = arith.constant 0.000000e+00 : f32
    %10 = vector.broadcast %cst_11 : f32 to vector<64x256xf32>
    %11 = arith.cmpf ogt, %9, %10 : vector<64x256xf32>
    %cst_12 = arith.constant 0.00999999977 : f32
    %12 = vector.broadcast %cst_12 : f32 to vector<64x256xf32>
    %13 = arith.mulf %12, %9 : vector<64x256xf32>
    %14 = arith.select %11, %9, %13 : vector<64x256xi1>, vector<64x256xf32>
    %cst_13 = arith.constant dense<0.000000e+00> : vector<2x256xf32>
    %15 = tpu.matmul %1, %14, %cst_13 {dimension_numbers = #tpu.dot_dimension_numbers<[1], [0], [0], [1], [0, 0, 1, 1], [], []>} : vector<2x64xf32>, vector<64x256xf32>, vector<2x256xf32> -> vector<2x256xf32>
    %16 = vector.broadcast %2 : vector<2x1xf32> to vector<2x256xf32>
    %17 = arith.addf %15, %16 : vector<2x256xf32>
    %c0_14 = arith.constant 0 : index
    %c0_15 = arith.constant 0 : index
    %c0_16 = arith.constant 0 : index
    %18 = vector.load %arg7[%c0_14, %c0_15, %c0_16] : memref<1x2x256xf32, #tpu.memory_space<vmem>>, vector<1x2x256xf32>
    %19 = vector.shape_cast %18 : vector<1x2x256xf32> to vector<2x256xf32>
    %20 = vector.shape_cast %17 : vector<2x256xf32> to vector<1x2x256xf32>
    tpu.vector_store %arg7[%c0_14, %c0_15, %c0_16], %20 {strides = array<i32>} : memref<1x2x256xf32, #tpu.memory_space<vmem>>, vector<1x2x256xf32>,
    return
  }
  func.func @transform_0(%arg0: i32, %arg1: i32) -> (i32, i32, i32) {
    %c0_i32 = arith.constant 0 : i32
    %c0_i32_0 = arith.constant 0 : i32
    return %arg0, %c0_i32, %arg1 : i32, i32, i32
  }
  func.func @transform_1(%arg0: i32, %arg1: i32) -> (i32, i32, i32) {
    %c0_i32 = arith.constant 0 : i32
    %c0_i32_0 = arith.constant 0 : i32
    %c0_i32_1 = arith.constant 0 : i32
    return %arg0, %c0_i32, %c0_i32_0 : i32, i32, i32
  }
  func.func @transform_2(%arg0: i32, %arg1: i32) -> (i32, i32) {
    %c0_i32 = arith.constant 0 : i32
    %c0_i32_0 = arith.constant 0 : i32
    %c0_i32_1 = arith.constant 0 : i32
    return %c0_i32, %c0_i32_0 : i32, i32
  }
  func.func @transform_3(%arg0: i32, %arg1: i32) -> (i32, i32) {
    %c0_i32 = arith.constant 0 : i32
    %c0_i32_0 = arith.constant 0 : i32
    %c0_i32_1 = arith.constant 0 : i32
    return %c0_i32, %c0_i32_0 : i32, i32
  }
  func.func @transform_4(%arg0: i32, %arg1: i32) -> (i32, i32) {
    %c0_i32 = arith.constant 0 : i32
    %c0_i32_0 = arith.constant 0 : i32
    %c0_i32_1 = arith.constant 0 : i32
    return %c0_i32, %c0_i32_0 : i32, i32
  }
  func.func @transform_5(%arg0: i32, %arg1: i32) -> (i32, i32, i32) {
    %c0_i32 = arith.constant 0 : i32
    %c0_i32_0 = arith.constant 0 : i32
    return %arg0, %c0_i32, %arg1 : i32, i32, i32
  }
}

</mosaic_0001>

<bundles_post_ra>
// kernel: tpu_custom_call.1
= control target key start
LH: loop header
LB: loop body
LE: loop exit
PB: predicated region body
PF: predicated region fallthrough
CT: control target
= control target key end

     0   :  { %10 = vsyncpa [#allocation3], 0  ;;  %s1034_s0 = inlined_call_operand.vmem [shape: f32[2,32,256], index: 0, kind: input, shape index: {}]   ;;  %s1035_s1 = inlined_call_operand.vmem [shape: f32[2,64,1], index: 1, kind: input, shape index: {}]   ;;  %s1036_s2 = inlined_call_operand.vmem [shape: f32[64,32], index: 2, kind: input, shape index: {}]   ;;  %s1037_s3 = inlined_call_operand.vmem [shape: f32[2,64], index: 3, kind: input, shape index: {}]   ;;  %s1038_s4 = inlined_call_operand.vmem [shape: f32[2,1], index: 4, kind: input, shape index: {}]   ;;  %s1039_s5 = inlined_call_operand.hbm [shape: f32[2,2,256], index: 5, kind: output, shape index: {}]  }
   0x1   :  { %12 = vsyncpa [#allocation3 + $0x1], 0  ;;  %s872_s18 = smov 0   ;;  %s874_s19 = smov 0  }
   0x2   :  { %s876_s20 = smov 0   ;;  %s878_s21 = smov 0  }
   0x3   :  { %s880_s22 = smov 0   ;;  %s882_s23 = smov 0  }
   0x4 LB: > { %s658_s24 = sadd.s32 4294967295, %s839_s23   ;;  %s659_s25 = sadd.s32 4294967294, %s839_s23   ;;  %s839_s23 = sphi %s882_s23, %s18_s23   ;;  %s835_s22 = sphi %s880_s22, %s1046_s22   ;;  %s831_s21 = sphi %s878_s21, %s1045_s21   ;;  %s827_s20 = sphi %s876_s20, %s1044_s20   ;;  %s823_s19 = sphi %s874_s19, %s1043_s19   ;;  %s819_s18 = sphi %s872_s18, %s1042_s18  }
   0x5   : > { %s30_s26 = sadd.s32 1, %s835_s22  ;;  %s156_s27 = sadd.s32 1, %s827_s20 }
   0x6   : > { %p32_p0 = scmp.ge.s32.totalorder %s30_s26, 2  ;;  %p166_p1 = scmp.ne.s32.totalorder %s827_s20, %s823_s19 }
   0x7   : > { %p167_p2 = scmp.eq.s32.totalorder %s658_s24, 1  ;;  %p172_p3 = scmp.ne.s32.totalorder %s823_s19, %s819_s18 }
   0x8   : > { %s1048_s26 = smov (%p32_p0, %s30_s26), 0  ;;  %p173_p5 = scmp.eq.s32.totalorder %s659_s25, 1 }
   0x9   : > { %p912_p4 = por %p167_p2, %p166_p1  ;;  %s151_s29 = ssub.s32 %s835_s22, %s1048_s26 }
   0xa   : > { %p662_p6 = scmp.ge.s32.totalorder %s839_s23, 1  ;;  %p154_p7 = scmp.eq.s32.totalorder %s151_s29, 0 }
   0xb   : > { %p919_p8 = por %p173_p5, %p172_p3  ;;  %p221_p9 = scmp.lt.s32.totalorder %s839_s23, 3 }
   0xc   : > { %s925_s6 = scalar_select %p154_p7, %s827_s20, %s156_s27  }
   0xd   : > { %p222_p10 = pnand %p662_p6, %p221_p9 }
   0xe   : > { %p259_p11 = scmp.lt.s32.totalorder (!%p222_p10), %s831_s21, 1  ;;  %s255_s27 = sand.u32 (!%p222_p10), 1, %s823_s19  }
   0xf   : > { %225 = sbr.rel (%p222_p10) target bundleno = 346 (0x15a), region = 40  ;;  %s663_s29 = sshll.u32 (!%p222_p10), %s255_s27, 2 }
  0x10   : > { %s781_s24 = scalar_lea.hbm (!%p222_p10), %s1039_s5, 8 }
  0x14   : > { %v841_v0 = vmov 0   ;;  %s260_s7 = scalar_select %p259_p11, %s831_s21, 1  ;;  %v274_v10 = vld [vmem:[%s1036_s2] sm:$0xff]  ;;  %vm340_vm0 = vcmask 261120   ;;  %v279_v11 = vld [vmem:[%s1036_s2 + $0x28] sm:$0xff]  ;;  %v280_v16 = vld [vmem:[%s1036_s2 + $0x30] sm:$0xff] }
  0x15   : > { %759 = vset.pattern.permute.xlu1 %v841_v0  ;;  %758 = vset.pattern.permute.xlu0 %v841_v0  ;;  %v275_v15 = vld [vmem:[%s1036_s2 + $0x8] sm:$0xff]  ;;  %v276_v20 = vld [vmem:[%s1036_s2 + $0x10] sm:$0xff]  ;;  %v281_v21 = vld [vmem:[%s1036_s2 + $0x38] sm:$0xff] }
  0x16   : > { %760 = vset.pattern.permute.xlu2 %v841_v0  ;;  %s691_s8 = sshll.u32 %s260_s7, 6  ;;  %v283_v23 = vld [vmem:[%s1038_s4] sm:$0x3]  ;;  %v277_v24 = vld [vmem:[%s1036_s2 + $0x18] sm:$0xff]  ;;  %s693_s7 = sshll.u32 %s831_s21, 2 }
  0x17   : > { %s266_s11 = scalar_lea.vmem %s1034_s0, %s691_s8  ;;  %s935_s14 = scalar_lea.vmem %s1035_s1, %s691_s8  ;;  %v278_v25 = vld [vmem:[%s1036_s2 + $0x20] sm:$0xff] }
  0x18   : > { %v290_v1 = vld [vmem:[%s266_s11 + $0x30] sm:$0xff]  ;;  %v291_v2 = vld [vmem:[%s266_s11 + $0x38] sm:$0xff]  ;;  %v297_v3 = vld [vmem:[%s935_s14 + $0x28] sm:$0xff]  ;;  %s565_s10 = scalar_lea.hbm %s1039_s5, %s693_s7  ;;  %s552_s21 = scalar_lea.sflag [#allocation3], %s255_s27 }
  0x19   : > { %377 = vmatpush.msra.mxu0 %v290_v1  ;;  %694 = vmatpush.msra.mxu2 %v290_v1  ;;  %v288_v4 = vld [vmem:[%s266_s11 + $0x20] sm:$0xff]  ;;  %v289_v5 = vld [vmem:[%s266_s11 + $0x28] sm:$0xff]  ;;  %v286_v6 = vld [vmem:[%s266_s11 + $0x10] sm:$0xff]  ;;  %s569_s13 = sshll.u32 %s565_s10, 4  ;;  %s570_s13 = int_to_ptr.hbm [resolvable:$true] %s569_s13 }
  0x1a   : > { %418 = vmatpush.msra.mxu1 %v291_v2  ;;  %698 = vmatpush.msra.mxu3 %v291_v2  ;;  %v287_v7 = vld [vmem:[%s266_s11 + $0x18] sm:$0xff]  ;;  %v284_v8 = vld [vmem:[%s266_s11] sm:$0xff]  ;;  %v285_v9 = vld [vmem:[%s266_s11 + $0x8] sm:$0xff]  ;;  %s257_s11 = scalar_lea.vmem [#allocation2], %s663_s29  ;;  %s775_s15 = sshra.s32 %s570_s13, 4  ;;  %s776_s15 = int_to_ptr.hbm [resolvable:$true] %s775_s15 }
  0x1b   : > { %327 = vperm.xlu1 %759, %v297_v3   ;;  %378 = vmatpush.msra.mxu0 %v288_v4  ;;  %v299_v12 = vld [vmem:[%s935_s14 + $0x38] sm:$0xff]  ;;  %v296_v13 = vld [vmem:[%s935_s14 + $0x20] sm:$0xff]  ;;  %v298_v17 = vld [vmem:[%s935_s14 + $0x30] sm:$0xff]  ;;  %s567_s12 = sshll.u32 %s257_s11, 4  ;;  %s777_s16 = scalar_lea.hbm %s776_s15, 4  ;;  %s568_s12 = int_to_ptr.vmem [resolvable:$true] %s567_s12 }
  0x1c   : > { %695 = vmatpush.msra.mxu2 %v288_v4  ;;  %419 = vmatpush.msra.mxu1 %v289_v5  ;;  %v295_v14 = vld [vmem:[%s935_s14 + $0x18] sm:$0xff]  ;;  %v292_v18 = vld [vmem:[%s935_s14] sm:$0xff]  ;;  %v294_v19 = vld [vmem:[%s935_s14 + $0x10] sm:$0xff]  ;;  %p778_p12 = scmp.ne.s32.totalorder %s776_s15, %s777_s16  ;;  %p782_p1 = scmp.lt.s32.totalorder %s776_s15, %s1039_s5 }
  0x1d   : > { %699 = vmatpush.msra.mxu3 %v289_v5  ;;  %379 = vmatpush.msra.mxu0 %v286_v6  ;;  %v293_v22 = vld [vmem:[%s935_s14 + $0x8] sm:$0xff]  ;;  %p783_p2 = scmp.lt.s32.totalorder %s781_s24, %s777_s16 }
  0x1e   : > { %696 = vmatpush.msra.mxu2 %v286_v6  ;;  %420 = vmatpush.msra.mxu1 %v287_v7  ;;  %p779_p13 = pnand %p778_p12, %p912_p4 }
  0x1f   : > { %700 = vmatpush.msra.mxu3 %v287_v7  ;;  %380 = vmatpush.msra.mxu0 %v284_v8  ;;  %p784_p3 = por %p783_p2, %p782_p1 }
  0x20   : > { %697 = vmatpush.msra.mxu2 %v284_v8  ;;  %421 = vmatpush.msra.mxu1 %v285_v9  ;;  %p780_p0 = pneg %p779_p13 }
  0x21   : > { %701 = vmatpush.msra.mxu3 %v285_v9  ;;  %668 = vmatmul.msk.f32.vlgmr.msra.gmra.mxu0 %vm340_vm0, %v274_v10 }
  0x22   : > { %673 = vmatmul.msk.f32.vlgmr.msra.gmra.mxu2 %vm340_vm0, %v279_v11  ;;  %676 = vmatmul.msk.f32.vlgmr.msra.gmra.mxu1 %vm340_vm0, %v274_v10  ;;  %p785_p5 = pnand %p784_p3, %p780_p0 }
  0x23   : > { %681 = vmatmul.msk.f32.vlgmr.msra.gmra.mxu3 %vm340_vm0, %v279_v11  ;;  %337 = vperm.xlu0 %758, %v299_v12  }
  0x24   : > { %322 = vperm.xlu1 %759, %v296_v13   ;;  %317 = vperm.xlu2 %760, %v295_v14  }
  0x29   : > { %669 = vmatmul.msk.f32.gmra.mxu0 %vm340_vm0, %v275_v15 }
  0x2a   : > { %674 = vmatmul.msk.f32.gmra.mxu2 %vm340_vm0, %v280_v16  ;;  %677 = vmatmul.msk.f32.gmra.mxu1 %vm340_vm0, %v275_v15 }
  0x2b   : > { %682 = vmatmul.msk.f32.gmra.mxu3 %vm340_vm0, %v280_v16  ;;  %332 = vperm.xlu0 %758, %v298_v17  }
  0x2c   : > { %302 = vperm.xlu1 %759, %v292_v18   ;;  %312 = vperm.xlu2 %760, %v294_v19  }
  0x31   : > { %670 = vmatmul.msk.f32.gmra.mxu0 %vm340_vm0, %v276_v20 }
  0x32   : > { %675 = vmatmul.msk.f32.gmra.mxu2 %vm340_vm0, %v281_v21  ;;  %678 = vmatmul.msk.f32.gmra.mxu1 %vm340_vm0, %v276_v20 }
  0x33   : > { %683 = vmatmul.msk.f32.gmra.mxu3 %vm340_vm0, %v281_v21  ;;  %307 = vperm.xlu0 %758, %v293_v22  }
  0x34   : > { %497 = vperm.xlu2 %760, %v283_v23  }
  0x39   : > { %671 = vmatmul.msk.f32.gmra.mxu0 %vm340_vm0, %v277_v24 }
  0x3a   : > { %679 = vmatmul.msk.f32.gmra.mxu1 %vm340_vm0, %v277_v24 }
  0x41   : > { %672 = vmatmul.msk.f32.gmra.mxu0 %vm340_vm0, %v278_v25 }
  0x42   : > { %680 = vmatmul.msk.f32.gmra.mxu1 %vm340_vm0, %v278_v25 }
  0x7e   : > { %v318_v38 = vpop.permute.xlu2 %317 }
  0x86   : > { %v313_v59 = vpop.permute.xlu2 %312 }
  0x8d   : > { %v328_v33 = vpop.permute.xlu1 %327 }
  0x95   : > { %v338_v32 = vpop.permute.xlu0 %337 }
  0x96   : > { %v323_v41 = vpop.permute.xlu1 %322 }
  0x9d   : > { %v333_v39 = vpop.permute.xlu0 %332 }
  0x9e   : > { %v988_v26 = vpop.f32.mrf.mxu0  ;;  %v303_v7 = vpop.permute.xlu1 %302 }
  0x9f   : > { %v990_v27 = vpop.f32.mrf.mxu1  ;;  %v383_v16 = vadd.f32 %v988_v26, %v303_v7 }
  0xa0   : > { %v424_v19 = vadd.f32 %v990_v27, %v303_v7 }
  0xa1   : > { %v463_v26 = vmul.f32 0.01, %v383_v16  ;;  %vm447_vm15 = vcmp.gt.f32.partialorder %v383_v16, 0.0 }
  0xa2   : > { %v464_v27 = vmul.f32 0.01, %v424_v19  ;;  %vm448_vm0 = vcmp.gt.f32.partialorder %v424_v19, 0.0 }
  0xa5   : > { %v397_v28 = vpop.f32.mrf.mxu2  ;;  %v308_v61 = vpop.permute.xlu0 %307 }
  0xa6   : > { %v438_v29 = vpop.f32.mrf.mxu3  ;;  %v385_v30 = vpop.f32.mrf.mxu0  ;;  %v398_v44 = vadd.f32 %v397_v28, %v328_v33 }
  0xa7   : > { %v426_v31 = vpop.f32.mrf.mxu1  ;;  %v439_v48 = vadd.f32 %v438_v29, %v328_v33  ;;  %v386_v8 = vadd.f32 %v385_v30, %v308_v61  ;;  %v479_v33 = vsel %vm447_vm15, %v383_v16, %v463_v26 }
  0xa8   : > { %v473_v56 = vmul.f32 0.01, %v398_v44  ;;  %vm457_vm5 = vcmp.gt.f32.partialorder %v398_v44, 0.0  ;;  %v427_v11 = vadd.f32 %v426_v31, %v308_v61 }
  0xa9   : > { %v474_v58 = vmul.f32 0.01, %v439_v48  ;;  %vm458_vm6 = vcmp.gt.f32.partialorder %v439_v48, 0.0  ;;  %v465_v23 = vmul.f32 0.01, %v386_v8  ;;  %vm449_vm13 = vcmp.gt.f32.partialorder %v386_v8, 0.0 }
  0xaa   : > { %v489_v2 = vsel %vm457_vm5, %v398_v44, %v473_v56  ;;  %v466_v25 = vmul.f32 0.01, %v427_v11  ;;  %vm450_vm14 = vcmp.gt.f32.partialorder %v427_v11, 0.0 }
  0xab   : > { %v490_v6 = vsel %vm458_vm6, %v439_v48, %v474_v58  ;;  %v481_v30 = vsel %vm449_vm13, %v386_v8, %v465_v23 }
  0xac   : > { %v482_v31 = vsel %vm450_vm14, %v427_v11, %v466_v25 }
  0xad   : > { %v400_v34 = vpop.f32.mrf.mxu2 }
  0xae   : > { %v441_v35 = vpop.f32.mrf.mxu3  ;;  %v388_v36 = vpop.f32.mrf.mxu0  ;;  %v401_v40 = vadd.f32 %v400_v34, %v333_v39  ;;  %v480_v34 = vsel %vm448_vm0, %v424_v19, %v464_v27 }
  0xaf   : > { %v429_v37 = vpop.f32.mrf.mxu1  ;;  %v442_v42 = vadd.f32 %v441_v35, %v333_v39  ;;  %v389_v3 = vadd.f32 %v388_v36, %v313_v59  ;;  %v498_v35 = vpop.permute.xlu2 %497 }
  0xb0   : > { %v475_v52 = vmul.f32 0.01, %v401_v40  ;;  %vm459_vm3 = vcmp.gt.f32.partialorder %v401_v40, 0.0  ;;  %v430_v9 = vadd.f32 %v429_v37, %v313_v59 }
  0xb1   : > { %v476_v54 = vmul.f32 0.01, %v442_v42  ;;  %vm460_vm4 = vcmp.gt.f32.partialorder %v442_v42, 0.0  ;;  %v467_v18 = vmul.f32 0.01, %v389_v3  ;;  %vm451_vm11 = vcmp.gt.f32.partialorder %v389_v3, 0.0 }
  0xb2   : > { %v491_v60 = vsel %vm459_vm3, %v401_v40, %v475_v52  ;;  %v468_v21 = vmul.f32 0.01, %v430_v9  ;;  %vm452_vm12 = vcmp.gt.f32.partialorder %v430_v9, 0.0 }
  0xb3   : > { %v492_v63 = vsel %vm460_vm4, %v442_v42, %v476_v54  ;;  %v483_v28 = vsel %vm451_vm11, %v389_v3, %v467_v18 }
  0xb4   : > { %v484_v29 = vsel %vm452_vm12, %v430_v9, %v468_v21 }
  0xb5   : > { %v403_v43 = vpop.f32.mrf.mxu2 }
  0xb6   : > { %v404_v45 = vadd.f32 %v403_v43, %v338_v32  ;;  %v444_v46 = vpop.f32.mrf.mxu3  ;;  %v391_v47 = vpop.f32.mrf.mxu0 }
  0xb7   : > { %v445_v49 = vadd.f32 %v444_v46, %v338_v32  ;;  %v432_v50 = vpop.f32.mrf.mxu1  ;;  %v392_v62 = vadd.f32 %v391_v47, %v318_v38  ;;  %v282_v32 = vld [vmem:[%s1037_s3] sm:$0x3] }
  0xb8   : > { %vm461_vm1 = vcmp.gt.f32.partialorder %v404_v45, 0.0  ;;  %v477_v51 = vmul.f32 0.01, %v404_v45  ;;  %v433_v0 = vadd.f32 %v432_v50, %v318_v38 }
  0xb9   : > { %vm462_vm2 = vcmp.gt.f32.partialorder %v445_v49, 0.0  ;;  %v478_v53 = vmul.f32 0.01, %v445_v49  ;;  %v469_v13 = vmul.f32 0.01, %v392_v62  ;;  %vm453_vm9 = vcmp.gt.f32.partialorder %v392_v62, 0.0 }
  0xba   : > { %v493_v55 = vsel %vm461_vm1, %v404_v45, %v477_v51  ;;  %v470_v15 = vmul.f32 0.01, %v433_v0  ;;  %vm454_vm10 = vcmp.gt.f32.partialorder %v433_v0, 0.0  ;;  %vm500_vm1 = vcmask 523264  }
  0xbb   : > { %512 = vmatpush.msrb.mxu2 %v493_v55  ;;  %v494_v57 = vsel %vm462_vm2, %v445_v49, %v478_v53  ;;  %v485_v22 = vsel %vm453_vm9, %v392_v62, %v469_v13  ;;  %vm547_vm2 = vcmask 1041408  }
  0xbc   : > { %532 = vmatpush.msrb.mxu3 %v494_v57  ;;  %v486_v24 = vsel %vm454_vm10, %v433_v0, %v470_v15 }
  0xbd   : > { %513 = vmatpush.msrb.mxu2 %v491_v60 }
  0xbe   : > { %533 = vmatpush.msrb.mxu3 %v492_v63  ;;  %v394_v1 = vpop.f32.mrf.mxu0 }
  0xbf   : > { %v395_v4 = vadd.f32 %v394_v1, %v323_v41  ;;  %v435_v5 = vpop.f32.mrf.mxu1  ;;  %514 = vmatpush.msrb.mxu2 %v489_v2 }
  0xc0   : > { %v436_v10 = vadd.f32 %v435_v5, %v323_v41  ;;  %534 = vmatpush.msrb.mxu3 %v490_v6 }
  0xc1   : > { %vm455_vm7 = vcmp.gt.f32.partialorder %v395_v4, 0.0  ;;  %v471_v12 = vmul.f32 0.01, %v395_v4 }
  0xc2   : > { %vm456_vm8 = vcmp.gt.f32.partialorder %v436_v10, 0.0  ;;  %v472_v14 = vmul.f32 0.01, %v436_v10 }
  0xc3   : > { %v487_v17 = vsel %vm455_vm7, %v395_v4, %v471_v12 }
  0xc4   : > { %515 = vmatpush.msrb.mxu2 %v487_v17  ;;  %v488_v20 = vsel %vm456_vm8, %v436_v10, %v472_v14 }
  0xc5   : > { %535 = vmatpush.msrb.mxu3 %v488_v20 }
  0xc6   : > { %516 = vmatpush.msrb.mxu2 %v485_v22 }
  0xc7   : > { %536 = vmatpush.msrb.mxu3 %v486_v24 }
  0xc8   : > { %517 = vmatpush.msrb.mxu2 %v483_v28 }
  0xc9   : > { %537 = vmatpush.msrb.mxu3 %v484_v29 }
  0xca   : > { %518 = vmatpush.msrb.mxu2 %v481_v30 }
  0xcb   : > { %538 = vmatpush.msrb.mxu3 %v482_v31 }
  0xcc   : > { %519 = vmatpush.msrb.mxu2 %v479_v33 }
  0xcd   : > { %539 = vmatpush.msrb.mxu3 %v480_v34  ;;  %684 = vmatmul.msk.f32.vlgmr.msrb.gmra.mxu2 %vm500_vm1, %v282_v32 }
  0xce   : > { %685 = vmatmul.msk.f32.vlgmr.msrb.gmra.mxu3 %vm500_vm1, %v282_v32 }
 0x150   : > { %v521_v36 = vpop.f32.mrf.mxu2 }
 0x151   : > { %v541_v37 = vpop.f32.mrf.mxu3  ;;  %v522_v39 = vadd.f32 %v521_v36, %v498_v35 }
 0x152   : > { %v542_v38 = vadd.f32 %v541_v37, %v498_v35 }
 0x154   : > { %v546_v40 = vrot.slane %v542_v38, 6 }
 0x156   : > { %v548_v41 = vsel %vm547_vm2, %v522_v39, %v546_v40 }
 0x157   : > { %550 = vst [vmem:[%s257_s11] sm:$0xf] %v548_v41 }
 0x158   : > { %788 = shalt.err (!%p785_p5)
}
 0x159   : > { %702 = dma.vmem_to_hbm [thread:$0]  (%p912_p4), %s568_s12, 64, %s570_s13, %s552_s21  }
 0x15a PF: > { %p708_p6 = scmp.ge.s32.totalorder %s839_s23, 2  ;;  %s581_s27 = sand.u32 1, %s819_s18  }
 0x15b   : > { %s582_s7 = scalar_lea.sflag [#allocation3], %s581_s27 }
 0x15c   : > { %p705_p7 = pnand %p708_p6, %p919_p8 }
 0x15e   : > { %p706_p9 = pneg %p705_p7 }
 0x160   : > { %814 = dma.done.wait (%p706_p9), %s582_s7, 64  }
 0x161   : > { %816 = vsyncadd (%p706_p9), %s582_s7, 4294967232  ;;  %s18_s23 = sadd.s32 1, %s839_s23   ;;  %s1042_s18 = smov %s823_s19 }
 0x162   : > { %p15_p10 = scmp.ge.s32.totalorder %s18_s23, 4   ;;  %s1043_s19 = smov %s827_s20 }
 0x163   : > { %s1044_s20 = smov %s925_s6  ;;  %s1045_s21 = smov %s835_s22 }
 0x164   : > { %s1046_s22 = smov %s1048_s26  ;;  %17 = sbr.rel (!%p15_p10) target bundleno = 4 (0x4), region = 78 }
 0x169   :  { %588 = vsyncpa [#allocation3], 1 }
 0x16a   :  { %590 = vsyncpa [#allocation3 + $0x1], 1 }

</bundles_post_ra>
